<compile_context>
chip_gen: v5e
topology: v5e:2x2
jax: 0.10.0
libtpu: 0.0.40
codegen_flags: <defaults>
</compile_context>

<pallas_src>
import jax
import jax.numpy as jnp
from jax.experimental import pallas as pl
from jax.experimental.pallas import tpu as pltpu

# ---- problem sizes (synthetic Env: f_node + f_task) -------------------------
F_NODE = 16
F_TASK = 8
NUM_STATE = F_NODE + F_TASK          # 24
H1, H2, H3, OUT = 64, 64, 16, 1
NEG_SLOPE = 0.01                     # PyTorch leaky_relu default
DROP_P = 0.5                         # F.dropout default
INV_KEEP = 1.0 / (1.0 - DROP_P)      # 2.0


def _round_up(n, m):
    return ((n + m - 1) // m) * m


def _leaky_relu(x):
    # max(x, 0.01*x) == leaky_relu for slope < 1
    return jnp.maximum(x, NEG_SLOPE * x)


def _rshift_logical(x, k):
    # logical right shift for int32 built from arithmetic shift + mask
    return (x >> k) & jnp.int32((1 << (32 - k)) - 1)


def _keep_mask(shape, seed, col_offset, salt):
    """Counter-based hash -> boolean keep mask with P(keep) = 0.5.

    Depends only on (seed, absolute element position, salt), so the mask is
    independent of the batch-tile size and differs per batch tile / per layer.
    Uses only int32 add/xor/shift ops (VPU-friendly, portable to interpret).
    """
    rows = jax.lax.broadcasted_iota(jnp.int32, shape, 0)
    cols = jax.lax.broadcasted_iota(jnp.int32, shape, 1) + col_offset
    x = (cols << 10) + (rows << 2) + salt
    x = x ^ seed
    # xorshift-style mixing rounds with odd additive constants (not crypto —
    # plenty for a dropout mask).
    for c in (-1640531527, 888888881, -1150833019):
        x = x + jnp.int32(c)
        x = x ^ (x << 13)
        x = x ^ _rshift_logical(x, 17)
        x = x ^ (x << 5)
    return x >= 0          # sign bit clear with probability exactly 1/2


def _dropout_p05(h, seed, col_offset, salt):
    keep = _keep_mask(h.shape, seed, col_offset, salt)
    return jnp.where(keep, h * INV_KEEP, 0.0)


def critic_kernel(seed_ref,                     # scalar-prefetch seed (SMEM)
                  x_ref,                        # (NUM_STATE, TB)  x^T tile
                  w1_ref, b1_ref,               # (64, 24), (64, 1)
                  w2_ref, b2_ref,               # (64, 64), (64, 1)
                  w3_ref, b3_ref,               # (16, 64), (16, 1)
                  w4_ref, b4_ref,               # (16, 1),  (1, 1)
                  o_ref):                       # (1, TB)
    tb = x_ref.shape[1]
    col0 = pl.program_id(0) * tb                # absolute batch offset of this tile
    seed = seed_ref[0]

    xb = x_ref[...]                                                    # (24, TB)

    # fc1 -> leaky_relu -> dropout(p=0.5)
    h = jnp.dot(w1_ref[...], xb, preferred_element_type=jnp.float32) + b1_ref[...]
    h = _dropout_p05(_leaky_relu(h), seed, col0, salt=1)               # (64, TB)

    # fc2 -> leaky_relu -> dropout(p=0.5)
    h = jnp.dot(w2_ref[...], h, preferred_element_type=jnp.float32) + b2_ref[...]
    h = _dropout_p05(_leaky_relu(h), seed, col0, salt=2)               # (64, TB)

    # fc3 -> leaky_relu
    h = jnp.dot(w3_ref[...], h, preferred_element_type=jnp.float32) + b3_ref[...]
    h = _leaky_relu(h)                                                 # (16, TB)

    # state_value head (16 -> 1): N=1 matmul wastes the MXU, so do it as a VPU
    # multiply + cross-sublane (XLU) reduction instead.
    v = jnp.sum(h * w4_ref[...], axis=0, keepdims=True) + b4_ref[...]  # (1, TB)
    o_ref[...] = v.astype(o_ref.dtype)


def critic_forward(x, params, seed, *, tb=None):
    """x: (B, NUM_STATE) f32.
    params: PyTorch-layout dict: w* of shape (out, in), b* of shape (out,).
    seed: int dropout seed.  Returns (B, 1) f32 values."""
    B = x.shape[0]
    assert x.shape[1] == NUM_STATE

    if tb is None:
        # Bigger tiles amortize per-grid-step overhead; weights are ~26 KiB so
        # VMEM never constrains.  Lane constraint: TB must be a multiple of 128.
        tb = 512 if B >= 512 else _round_up(max(B, 1), 128)
    b_pad = _round_up(B, tb)
    grid = (pl.cdiv(b_pad, tb),)

    # Feature-major layout: batch on the lane axis.
    x_pad = jnp.pad(x.astype(jnp.float32), ((0, b_pad - B), (0, 0)))
    xt = x_pad.T                                                       # (24, b_pad)

    # PyTorch-layout params -> kernel layout: weights stay (out, in); biases
    # become (out, 1) columns; the head weight becomes a (16, 1) column.
    w1, b1 = params["w1"], params["b1"].reshape(H1, 1)
    w2, b2 = params["w2"], params["b2"].reshape(H2, 1)
    w3, b3 = params["w3"], params["b3"].reshape(H3, 1)
    w4c = params["w4"].reshape(H3, 1)
    b4 = params["b4"].reshape(1, 1)

    seed_arr = jnp.asarray([seed], dtype=jnp.int32)

    def const(shape):
        # weights/biases: same block every grid step -> stay resident in VMEM
        return pl.BlockSpec(shape, lambda i, s: (0, 0))

    flops = 2 * b_pad * (NUM_STATE * H1 + H1 * H2 + H2 * H3 + H3 * OUT)
    bytes_accessed = 4 * (b_pad * (NUM_STATE + OUT)
                          + NUM_STATE * H1 + H1 * H2 + H2 * H3 + H3 * OUT
                          + H1 + H2 + H3 + OUT)

    out_t = pl.pallas_call(
        critic_kernel,
        out_shape=jax.ShapeDtypeStruct((1, b_pad), jnp.float32),
        grid_spec=pltpu.PrefetchScalarGridSpec(
            num_scalar_prefetch=1,
            grid=grid,
            in_specs=[
                pl.BlockSpec((NUM_STATE, tb), lambda i, s: (0, i)),   # x^T (streamed)
                const((H1, NUM_STATE)), const((H1, 1)),               # fc1
                const((H2, H1)),        const((H2, 1)),               # fc2
                const((H3, H2)),        const((H3, 1)),               # fc3
                const((H3, 1)),         const((1, 1)),                # head
            ],
            out_specs=pl.BlockSpec((1, tb), lambda i, s: (0, i)),
        ),
        compiler_params=pltpu.CompilerParams(
            dimension_semantics=("parallel",)),
        cost_estimate=pl.CostEstimate(flops=flops, transcendentals=0,
                                      bytes_accessed=bytes_accessed),
    )(seed_arr, xt, w1, b1, w2, b2, w3, b3, w4c, b4)

    return out_t[0, :B].reshape(B, OUT)


def init_params(key):
    """Deterministic init mimicking nn.Linear: uniform +-1/sqrt(fan_in).
    Stored in PyTorch layout: weight (out, in), bias (out,)."""
    def linear(k, fan_in, fan_out):
        kw, kb = jax.random.split(k)
        bound = float(fan_in) ** -0.5
        w = jax.random.uniform(kw, (fan_out, fan_in), jnp.float32, -bound, bound)
        b = jax.random.uniform(kb, (fan_out,), jnp.float32, -bound, bound)
        return w, b

    k1, k2, k3, k4 = jax.random.split(key, 4)
    w1, b1 = linear(k1, NUM_STATE, H1)
    w2, b2 = linear(k2, H1, H2)
    w3, b3 = linear(k3, H2, H3)
    w4, b4 = linear(k4, H3, OUT)
    return {"w1": w1, "b1": b1, "w2": w2, "b2": b2,
            "w3": w3, "b3": b3, "w4": w4, "b4": b4}


if __name__ == "__main__":
    key = jax.random.PRNGKey(0)
    k_params, k_x, k_x2 = jax.random.split(key, 3)

    params = init_params(k_params)

    # Small batch (single tile).
    B = 8
    x = jax.random.normal(k_x, (B, NUM_STATE), dtype=jnp.float32)
    value = critic_forward(x, params, seed=1234)
    value = jax.block_until_ready(value)
    assert value.shape == (B, OUT)
    assert value.dtype == jnp.float32
    assert bool(jnp.all(jnp.isfinite(value)))

    # Ragged batch with a forced small tile to exercise the multi-step grid
    # (padding + per-tile dropout seeding path).
    B2 = 260
    x2 = jax.random.normal(k_x2, (B2, NUM_STATE), dtype=jnp.float32)
    value2 = critic_forward(x2, params, seed=1234, tb=128)
    value2 = jax.block_until_ready(value2)
    assert value2.shape == (B2, OUT)
    assert bool(jnp.all(jnp.isfinite(value2)))

    print("KERNEL_OK")
</pallas_src>

<mosaic_0001>
module attributes {stable_mosaic.version = 11 : i64} {
  func.func @critic_kernel(%arg0: i32, %arg1: memref<1xi32, #tpu.memory_space<smem>>, %arg2: memref<24x128xf32, #tpu.memory_space<vmem>>, %arg3: memref<64x24xf32, #tpu.memory_space<vmem>>, %arg4: memref<64x1xf32, #tpu.memory_space<vmem>>, %arg5: memref<64x64xf32, #tpu.memory_space<vmem>>, %arg6: memref<64x1xf32, #tpu.memory_space<vmem>>, %arg7: memref<16x64xf32, #tpu.memory_space<vmem>>, %arg8: memref<16x1xf32, #tpu.memory_space<vmem>>, %arg9: memref<16x1xf32, #tpu.memory_space<vmem>>, %arg10: memref<1x1xf32, #tpu.memory_space<vmem>>, %arg11: memref<1x128xf32, #tpu.memory_space<vmem>>) attributes {dimension_semantics = [#tpu.dimension_semantics<parallel>], iteration_bounds = array<i64: 1>, scalar_prefetch = 1 : i64, scratch_operands = 0 : i64, tpu.core_type = #tpu.core_type<tc>, window_params = [{transform_indices = @transform_0, window_bounds = array<i64: 24, 128>}, {pipeline_mode = #tpu.pipeline_mode<synchronous>, transform_indices = @transform_1, window_bounds = array<i64: 64, 24>}, {pipeline_mode = #tpu.pipeline_mode<synchronous>, transform_indices = @transform_2, window_bounds = array<i64: 64, 1>}, {pipeline_mode = #tpu.pipeline_mode<synchronous>, transform_indices = @transform_3, window_bounds = array<i64: 64, 64>}, {pipeline_mode = #tpu.pipeline_mode<synchronous>, transform_indices = @transform_4, window_bounds = array<i64: 64, 1>}, {pipeline_mode = #tpu.pipeline_mode<synchronous>, transform_indices = @transform_5, window_bounds = array<i64: 16, 64>}, {pipeline_mode = #tpu.pipeline_mode<synchronous>, transform_indices = @transform_6, window_bounds = array<i64: 16, 1>}, {pipeline_mode = #tpu.pipeline_mode<synchronous>, transform_indices = @transform_7, window_bounds = array<i64: 16, 1>}, {pipeline_mode = #tpu.pipeline_mode<synchronous>, transform_indices = @transform_8, window_bounds = array<i64: 1, 1>}, {transform_indices = @transform_9, window_bounds = array<i64: 1, 128>}]} {
    %c128_i32 = arith.constant 128 : i32
    %0 = arith.muli %arg0, %c128_i32 : i32
    %c0 = arith.constant 0 : index
    %1 = memref.load %arg1[%c0] : memref<1xi32, #tpu.memory_space<smem>>
    %c0_0 = arith.constant 0 : index
    %c0_1 = arith.constant 0 : index
    %2 = vector.load %arg2[%c0_0, %c0_1] : memref<24x128xf32, #tpu.memory_space<vmem>>, vector<24x128xf32>
    %c0_2 = arith.constant 0 : index
    %c0_3 = arith.constant 0 : index
    %3 = vector.load %arg3[%c0_2, %c0_3] : memref<64x24xf32, #tpu.memory_space<vmem>>, vector<64x24xf32>
    %cst = arith.constant dense<0.000000e+00> : vector<64x128xf32>
    %4 = tpu.matmul %3, %2, %cst {dimension_numbers = #tpu.dot_dimension_numbers<[1], [0], [0], [1], [0, 0, 1, 1], [], []>} : vector<64x24xf32>, vector<24x128xf32>, vector<64x128xf32> -> vector<64x128xf32>
    %c0_4 = arith.constant 0 : index
    %c0_5 = arith.constant 0 : index
    %5 = vector.load %arg4[%c0_4, %c0_5] : memref<64x1xf32, #tpu.memory_space<vmem>>, vector<64x1xf32>
    %6 = vector.broadcast %5 : vector<64x1xf32> to vector<64x128xf32>
    %7 = arith.addf %4, %6 : vector<64x128xf32>
    %cst_6 = arith.constant 0.00999999977 : f32
    %8 = vector.broadcast %cst_6 : f32 to vector<64x128xf32>
    %9 = arith.mulf %8, %7 : vector<64x128xf32>
    %10 = arith.maximumf %7, %9 : vector<64x128xf32>
    %11 = tpu.iota {dimensions = array<i32: 0>} : vector<64x128xi32>
    %12 = tpu.iota {dimensions = array<i32: 1>} : vector<64x128xi32>
    %13 = vector.broadcast %0 : i32 to vector<64x128xi32>
    %14 = arith.addi %12, %13 : vector<64x128xi32>
    %c10_i32 = arith.constant 10 : i32
    %15 = vector.broadcast %c10_i32 : i32 to vector<64x128xi32>
    %16 = arith.shli %14, %15 : vector<64x128xi32>
    %c2_i32 = arith.constant 2 : i32
    %17 = vector.broadcast %c2_i32 : i32 to vector<64x128xi32>
    %18 = arith.shli %11, %17 : vector<64x128xi32>
    %19 = arith.addi %16, %18 : vector<64x128xi32>
    %c1_i32 = arith.constant 1 : i32
    %20 = vector.broadcast %c1_i32 : i32 to vector<64x128xi32>
    %21 = arith.addi %19, %20 : vector<64x128xi32>
    %22 = vector.broadcast %1 : i32 to vector<64x128xi32>
    %23 = arith.xori %21, %22 : vector<64x128xi32>
    %c-1640531527_i32 = arith.constant -1640531527 : i32
    %24 = vector.broadcast %c-1640531527_i32 : i32 to vector<64x128xi32>
    %25 = arith.addi %23, %24 : vector<64x128xi32>
    %c13_i32 = arith.constant 13 : i32
    %26 = vector.broadcast %c13_i32 : i32 to vector<64x128xi32>
    %27 = arith.shli %25, %26 : vector<64x128xi32>
    %28 = arith.xori %25, %27 : vector<64x128xi32>
    %c17_i32 = arith.constant 17 : i32
    %29 = vector.broadcast %c17_i32 : i32 to vector<64x128xi32>
    %30 = arith.shrsi %28, %29 : vector<64x128xi32>
    %c32767_i32 = arith.constant 32767 : i32
    %31 = vector.broadcast %c32767_i32 : i32 to vector<64x128xi32>
    %32 = arith.andi %30, %31 : vector<64x128xi32>
    %33 = arith.xori %28, %32 : vector<64x128xi32>
    %c5_i32 = arith.constant 5 : i32
    %34 = vector.broadcast %c5_i32 : i32 to vector<64x128xi32>
    %35 = arith.shli %33, %34 : vector<64x128xi32>
    %36 = arith.xori %33, %35 : vector<64x128xi32>
    %c888888881_i32 = arith.constant 888888881 : i32
    %37 = vector.broadcast %c888888881_i32 : i32 to vector<64x128xi32>
    %38 = arith.addi %36, %37 : vector<64x128xi32>
    %c13_i32_7 = arith.constant 13 : i32
    %39 = vector.broadcast %c13_i32_7 : i32 to vector<64x128xi32>
    %40 = arith.shli %38, %39 : vector<64x128xi32>
    %41 = arith.xori %38, %40 : vector<64x128xi32>
    %c17_i32_8 = arith.constant 17 : i32
    %42 = vector.broadcast %c17_i32_8 : i32 to vector<64x128xi32>
    %43 = arith.shrsi %41, %42 : vector<64x128xi32>
    %c32767_i32_9 = arith.constant 32767 : i32
    %44 = vector.broadcast %c32767_i32_9 : i32 to vector<64x128xi32>
    %45 = arith.andi %43, %44 : vector<64x128xi32>
    %46 = arith.xori %41, %45 : vector<64x128xi32>
    %c5_i32_10 = arith.constant 5 : i32
    %47 = vector.broadcast %c5_i32_10 : i32 to vector<64x128xi32>
    %48 = arith.shli %46, %47 : vector<64x128xi32>
    %49 = arith.xori %46, %48 : vector<64x128xi32>
    %c-1150833019_i32 = arith.constant -1150833019 : i32
    %50 = vector.broadcast %c-1150833019_i32 : i32 to vector<64x128xi32>
    %51 = arith.addi %49, %50 : vector<64x128xi32>
    %c13_i32_11 = arith.constant 13 : i32
    %52 = vector.broadcast %c13_i32_11 : i32 to vector<64x128xi32>
    %53 = arith.shli %51, %52 : vector<64x128xi32>
    %54 = arith.xori %51, %53 : vector<64x128xi32>
    %c17_i32_12 = arith.constant 17 : i32
    %55 = vector.broadcast %c17_i32_12 : i32 to vector<64x128xi32>
    %56 = arith.shrsi %54, %55 : vector<64x128xi32>
    %c32767_i32_13 = arith.constant 32767 : i32
    %57 = vector.broadcast %c32767_i32_13 : i32 to vector<64x128xi32>
    %58 = arith.andi %56, %57 : vector<64x128xi32>
    %59 = arith.xori %54, %58 : vector<64x128xi32>
    %c5_i32_14 = arith.constant 5 : i32
    %60 = vector.broadcast %c5_i32_14 : i32 to vector<64x128xi32>
    %61 = arith.shli %59, %60 : vector<64x128xi32>
    %62 = arith.xori %59, %61 : vector<64x128xi32>
    %c0_i32 = arith.constant 0 : i32
    %63 = vector.broadcast %c0_i32 : i32 to vector<64x128xi32>
    %64 = arith.cmpi sge, %62, %63 : vector<64x128xi32>
    %cst_15 = arith.constant 2.000000e+00 : f32
    %65 = vector.broadcast %cst_15 : f32 to vector<64x128xf32>
    %66 = arith.mulf %10, %65 : vector<64x128xf32>
    %cst_16 = arith.constant 0.000000e+00 : f32
    %67 = vector.broadcast %cst_16 : f32 to vector<64x128xf32>
    %68 = arith.select %64, %66, %67 : vector<64x128xi1>, vector<64x128xf32>
    %c0_17 = arith.constant 0 : index
    %c0_18 = arith.constant 0 : index
    %69 = vector.load %arg5[%c0_17, %c0_18] : memref<64x64xf32, #tpu.memory_space<vmem>>, vector<64x64xf32>
    %cst_19 = arith.constant dense<0.000000e+00> : vector<64x128xf32>
    %70 = tpu.matmul %69, %68, %cst_19 {dimension_numbers = #tpu.dot_dimension_numbers<[1], [0], [0], [1], [0, 0, 1, 1], [], []>} : vector<64x64xf32>, vector<64x128xf32>, vector<64x128xf32> -> vector<64x128xf32>
    %c0_20 = arith.constant 0 : index
    %c0_21 = arith.constant 0 : index
    %71 = vector.load %arg6[%c0_20, %c0_21] : memref<64x1xf32, #tpu.memory_space<vmem>>, vector<64x1xf32>
    %72 = vector.broadcast %71 : vector<64x1xf32> to vector<64x128xf32>
    %73 = arith.addf %70, %72 : vector<64x128xf32>
    %cst_22 = arith.constant 0.00999999977 : f32
    %74 = vector.broadcast %cst_22 : f32 to vector<64x128xf32>
    %75 = arith.mulf %74, %73 : vector<64x128xf32>
    %76 = arith.maximumf %73, %75 : vector<64x128xf32>
    %77 = tpu.iota {dimensions = array<i32: 0>} : vector<64x128xi32>
    %78 = tpu.iota {dimensions = array<i32: 1>} : vector<64x128xi32>
    %79 = vector.broadcast %0 : i32 to vector<64x128xi32>
    %80 = arith.addi %78, %79 : vector<64x128xi32>
    %c10_i32_23 = arith.constant 10 : i32
    %81 = vector.broadcast %c10_i32_23 : i32 to vector<64x128xi32>
    %82 = arith.shli %80, %81 : vector<64x128xi32>
    %c2_i32_24 = arith.constant 2 : i32
    %83 = vector.broadcast %c2_i32_24 : i32 to vector<64x128xi32>
    %84 = arith.shli %77, %83 : vector<64x128xi32>
    %85 = arith.addi %82, %84 : vector<64x128xi32>
    %c2_i32_25 = arith.constant 2 : i32
    %86 = vector.broadcast %c2_i32_25 : i32 to vector<64x128xi32>
    %87 = arith.addi %85, %86 : vector<64x128xi32>
    %88 = vector.broadcast %1 : i32 to vector<64x128xi32>
    %89 = arith.xori %87, %88 : vector<64x128xi32>
    %c-1640531527_i32_26 = arith.constant -1640531527 : i32
    %90 = vector.broadcast %c-1640531527_i32_26 : i32 to vector<64x128xi32>
    %91 = arith.addi %89, %90 : vector<64x128xi32>
    %c13_i32_27 = arith.constant 13 : i32
    %92 = vector.broadcast %c13_i32_27 : i32 to vector<64x128xi32>
    %93 = arith.shli %91, %92 : vector<64x128xi32>
    %94 = arith.xori %91, %93 : vector<64x128xi32>
    %c17_i32_28 = arith.constant 17 : i32
    %95 = vector.broadcast %c17_i32_28 : i32 to vector<64x128xi32>
    %96 = arith.shrsi %94, %95 : vector<64x128xi32>
    %c32767_i32_29 = arith.constant 32767 : i32
    %97 = vector.broadcast %c32767_i32_29 : i32 to vector<64x128xi32>
    %98 = arith.andi %96, %97 : vector<64x128xi32>
    %99 = arith.xori %94, %98 : vector<64x128xi32>
    %c5_i32_30 = arith.constant 5 : i32
    %100 = vector.broadcast %c5_i32_30 : i32 to vector<64x128xi32>
    %101 = arith.shli %99, %100 : vector<64x128xi32>
    %102 = arith.xori %99, %101 : vector<64x128xi32>
    %c888888881_i32_31 = arith.constant 888888881 : i32
    %103 = vector.broadcast %c888888881_i32_31 : i32 to vector<64x128xi32>
    %104 = arith.addi %102, %103 : vector<64x128xi32>
    %c13_i32_32 = arith.constant 13 : i32
    %105 = vector.broadcast %c13_i32_32 : i32 to vector<64x128xi32>
    %106 = arith.shli %104, %105 : vector<64x128xi32>
    %107 = arith.xori %104, %106 : vector<64x128xi32>
    %c17_i32_33 = arith.constant 17 : i32
    %108 = vector.broadcast %c17_i32_33 : i32 to vector<64x128xi32>
    %109 = arith.shrsi %107, %108 : vector<64x128xi32>
    %c32767_i32_34 = arith.constant 32767 : i32
    %110 = vector.broadcast %c32767_i32_34 : i32 to vector<64x128xi32>
    %111 = arith.andi %109, %110 : vector<64x128xi32>
    %112 = arith.xori %107, %111 : vector<64x128xi32>
    %c5_i32_35 = arith.constant 5 : i32
    %113 = vector.broadcast %c5_i32_35 : i32 to vector<64x128xi32>
    %114 = arith.shli %112, %113 : vector<64x128xi32>
    %115 = arith.xori %112, %114 : vector<64x128xi32>
    %c-1150833019_i32_36 = arith.constant -1150833019 : i32
    %116 = vector.broadcast %c-1150833019_i32_36 : i32 to vector<64x128xi32>
    %117 = arith.addi %115, %116 : vector<64x128xi32>
    %c13_i32_37 = arith.constant 13 : i32
    %118 = vector.broadcast %c13_i32_37 : i32 to vector<64x128xi32>
    %119 = arith.shli %117, %118 : vector<64x128xi32>
    %120 = arith.xori %117, %119 : vector<64x128xi32>
    %c17_i32_38 = arith.constant 17 : i32
    %121 = vector.broadcast %c17_i32_38 : i32 to vector<64x128xi32>
    %122 = arith.shrsi %120, %121 : vector<64x128xi32>
    %c32767_i32_39 = arith.constant 32767 : i32
    %123 = vector.broadcast %c32767_i32_39 : i32 to vector<64x128xi32>
    %124 = arith.andi %122, %123 : vector<64x128xi32>
    %125 = arith.xori %120, %124 : vector<64x128xi32>
    %c5_i32_40 = arith.constant 5 : i32
    %126 = vector.broadcast %c5_i32_40 : i32 to vector<64x128xi32>
    %127 = arith.shli %125, %126 : vector<64x128xi32>
    %128 = arith.xori %125, %127 : vector<64x128xi32>
    %c0_i32_41 = arith.constant 0 : i32
    %129 = vector.broadcast %c0_i32_41 : i32 to vector<64x128xi32>
    %130 = arith.cmpi sge, %128, %129 : vector<64x128xi32>
    %cst_42 = arith.constant 2.000000e+00 : f32
    %131 = vector.broadcast %cst_42 : f32 to vector<64x128xf32>
    %132 = arith.mulf %76, %131 : vector<64x128xf32>
    %cst_43 = arith.constant 0.000000e+00 : f32
    %133 = vector.broadcast %cst_43 : f32 to vector<64x128xf32>
    %134 = arith.select %130, %132, %133 : vector<64x128xi1>, vector<64x128xf32>
    %c0_44 = arith.constant 0 : index
    %c0_45 = arith.constant 0 : index
    %135 = vector.load %arg7[%c0_44, %c0_45] : memref<16x64xf32, #tpu.memory_space<vmem>>, vector<16x64xf32>
    %cst_46 = arith.constant dense<0.000000e+00> : vector<16x128xf32>
    %136 = tpu.matmul %135, %134, %cst_46 {dimension_numbers = #tpu.dot_dimension_numbers<[1], [0], [0], [1], [0, 0, 1, 1], [], []>} : vector<16x64xf32>, vector<64x128xf32>, vector<16x128xf32> -> vector<16x128xf32>
    %c0_47 = arith.constant 0 : index
    %c0_48 = arith.constant 0 : index
    %137 = vector.load %arg8[%c0_47, %c0_48] : memref<16x1xf32, #tpu.memory_space<vmem>>, vector<16x1xf32>
    %138 = vector.broadcast %137 : vector<16x1xf32> to vector<16x128xf32>
    %139 = arith.addf %136, %138 : vector<16x128xf32>
    %cst_49 = arith.constant 0.00999999977 : f32
    %140 = vector.broadcast %cst_49 : f32 to vector<16x128xf32>
    %141 = arith.mulf %140, %139 : vector<16x128xf32>
    %142 = arith.maximumf %139, %141 : vector<16x128xf32>
    %c0_50 = arith.constant 0 : index
    %c0_51 = arith.constant 0 : index
    %143 = vector.load %arg9[%c0_50, %c0_51] : memref<16x1xf32, #tpu.memory_space<vmem>>, vector<16x1xf32>
    %144 = vector.broadcast %143 : vector<16x1xf32> to vector<16x128xf32>
    %145 = arith.mulf %142, %144 : vector<16x128xf32>
    %cst_52 = arith.constant dense<0.000000e+00> : vector<128xf32>
    %146 = vector.multi_reduction <add>, %145, %cst_52 [0] : vector<16x128xf32> to vector<128xf32>
    %147 = vector.shape_cast %146 : vector<128xf32> to vector<1x128xf32>
    %c0_53 = arith.constant 0 : index
    %c0_54 = arith.constant 0 : index
    %148 = vector.load %arg10[%c0_53, %c0_54] : memref<1x1xf32, #tpu.memory_space<vmem>>, vector<1x1xf32>
    %149 = vector.broadcast %148 : vector<1x1xf32> to vector<1x128xf32>
    %150 = arith.addf %147, %149 : vector<1x128xf32>
    %c0_55 = arith.constant 0 : index
    %c0_56 = arith.constant 0 : index
    %151 = vector.load %arg11[%c0_55, %c0_56] : memref<1x128xf32, #tpu.memory_space<vmem>>, vector<1x128xf32>
    tpu.vector_store %arg11[%c0_55, %c0_56], %150 {strides = array<i32>} : memref<1x128xf32, #tpu.memory_space<vmem>>, vector<1x128xf32>,
    return
  }
  func.func @transform_0(%arg0: i32, %arg1: memref<1xi32, #tpu.memory_space<smem>>) -> (i32, i32) {
    %c0_i32 = arith.constant 0 : i32
    %c0_i32_0 = arith.constant 0 : i32
    return %c0_i32, %arg0 : i32, i32
  }
  func.func @transform_1(%arg0: i32, %arg1: memref<1xi32, #tpu.memory_space<smem>>) -> (i32, i32) {
    %c0_i32 = arith.constant 0 : i32
    %c0_i32_0 = arith.constant 0 : i32
    %c0_i32_1 = arith.constant 0 : i32
    return %c0_i32, %c0_i32_0 : i32, i32
  }
  func.func @transform_2(%arg0: i32, %arg1: memref<1xi32, #tpu.memory_space<smem>>) -> (i32, i32) {
    %c0_i32 = arith.constant 0 : i32
    %c0_i32_0 = arith.constant 0 : i32
    %c0_i32_1 = arith.constant 0 : i32
    return %c0_i32, %c0_i32_0 : i32, i32
  }
  func.func @transform_3(%arg0: i32, %arg1: memref<1xi32, #tpu.memory_space<smem>>) -> (i32, i32) {
    %c0_i32 = arith.constant 0 : i32
    %c0_i32_0 = arith.constant 0 : i32
    %c0_i32_1 = arith.constant 0 : i32
    return %c0_i32, %c0_i32_0 : i32, i32
  }
  func.func @transform_4(%arg0: i32, %arg1: memref<1xi32, #tpu.memory_space<smem>>) -> (i32, i32) {
    %c0_i32 = arith.constant 0 : i32
    %c0_i32_0 = arith.constant 0 : i32
    %c0_i32_1 = arith.constant 0 : i32
    return %c0_i32, %c0_i32_0 : i32, i32
  }
  func.func @transform_5(%arg0: i32, %arg1: memref<1xi32, #tpu.memory_space<smem>>) -> (i32, i32) {
    %c0_i32 = arith.constant 0 : i32
    %c0_i32_0 = arith.constant 0 : i32
    %c0_i32_1 = arith.constant 0 : i32
    return %c0_i32, %c0_i32_0 : i32, i32
  }
  func.func @transform_6(%arg0: i32, %arg1: memref<1xi32, #tpu.memory_space<smem>>) -> (i32, i32) {
    %c0_i32 = arith.constant 0 : i32
    %c0_i32_0 = arith.constant 0 : i32
    %c0_i32_1 = arith.constant 0 : i32
    return %c0_i32, %c0_i32_0 : i32, i32
  }
  func.func @transform_7(%arg0: i32, %arg1: memref<1xi32, #tpu.memory_space<smem>>) -> (i32, i32) {
    %c0_i32 = arith.constant 0 : i32
    %c0_i32_0 = arith.constant 0 : i32
    %c0_i32_1 = arith.constant 0 : i32
    return %c0_i32, %c0_i32_0 : i32, i32
  }
  func.func @transform_8(%arg0: i32, %arg1: memref<1xi32, #tpu.memory_space<smem>>) -> (i32, i32) {
    %c0_i32 = arith.constant 0 : i32
    %c0_i32_0 = arith.constant 0 : i32
    %c0_i32_1 = arith.constant 0 : i32
    return %c0_i32, %c0_i32_0 : i32, i32
  }
  func.func @transform_9(%arg0: i32, %arg1: memref<1xi32, #tpu.memory_space<smem>>) -> (i32, i32) {
    %c0_i32 = arith.constant 0 : i32
    %c0_i32_0 = arith.constant 0 : i32
    return %c0_i32, %arg0 : i32, i32
  }
}

</mosaic_0001>

<bundles_post_ra>
// kernel: tpu_custom_call.1
= control target key start
LH: loop header
LB: loop body
LE: loop exit
PB: predicated region body
PF: predicated region fallthrough
CT: control target
= control target key end

     0   :  { %s1323_s0 = inlined_call_operand.<no memory space> [shape: s32[1], index: 0, kind: input, shape index: {}]   ;;  %s1324_s1 = inlined_call_operand.vmem [shape: f32[24,128], index: 1, kind: input, shape index: {}]   ;;  %s1325_s2 = inlined_call_operand.vmem [shape: f32[64,24], index: 2, kind: input, shape index: {}]   ;;  %s1326_s3 = inlined_call_operand.vmem [shape: f32[64,1], index: 3, kind: input, shape index: {}]   ;;  %s1327_s4 = inlined_call_operand.vmem [shape: f32[64,64], index: 4, kind: input, shape index: {}]   ;;  %s1328_s5 = inlined_call_operand.vmem [shape: f32[64,1], index: 5, kind: input, shape index: {}]   ;;  %s1329_s6 = inlined_call_operand.vmem [shape: f32[16,64], index: 6, kind: input, shape index: {}]   ;;  %s1330_s7 = inlined_call_operand.vmem [shape: f32[16,1], index: 7, kind: input, shape index: {}]   ;;  %s1331_s8 = inlined_call_operand.vmem [shape: f32[16,1], index: 8, kind: input, shape index: {}]   ;;  %s1332_s9 = inlined_call_operand.<no memory space> [shape: f32[1,1], index: 9, kind: input, shape index: {}]   ;;  %s1333_s10 = inlined_call_operand.hbm [shape: f32[1,128], index: 10, kind: output, shape index: {}]  }
   0x1   :  { %v16_v0 = vstv %s1332_s9 }
   0x2   :  { %17 = vst [vmem:[#allocation4] sm:$0x1] %v16_v0 }
   0x3   :  { %v41_v1 = vld [vmem:[%s1324_s1 + $0x10] sm:$0xff]  ;;  %v57_v2 = vld [vmem:[%s1326_s3 + $0x38] sm:$0xff]  ;;  %v55_v3 = vld [vmem:[%s1326_s3 + $0x28] sm:$0xff]  ;;  %v1030_v4 = vmov 0   ;;  %vm98_vm0 = vcmask 195584  }
   0x4   :  { %1002 = vset.pattern.permute.xlu1 %v1030_v4  ;;  %1001 = vset.pattern.permute.xlu0 %v1030_v4  ;;  %v40_v5 = vld [vmem:[%s1324_s1 + $0x8] sm:$0xff]  ;;  %v39_v6 = vld [vmem:[%s1324_s1] sm:$0xff]  ;;  %v48_v8 = vld [vmem:[%s1325_s2 + $0x30] sm:$0xff] }
   0x5   :  { %136 = vmatpush.msra.mxu0 %v41_v1  ;;  %95 = vperm.xlu0 %1001, %v57_v2   ;;  %v42_v7 = vld [vmem:[%s1325_s2] sm:$0xff]  ;;  %v53_v9 = vld [vmem:[%s1326_s3 + $0x18] sm:$0xff]  ;;  %v56_v10 = vld [vmem:[%s1326_s3 + $0x30] sm:$0xff] }
   0x6   :  { %85 = vperm.xlu1 %1002, %v55_v3   ;;  %988 = vmatpush.msra.mxu2 %v41_v1 }
   0x7   :  { %137 = vmatpush.msra.mxu0 %v40_v5  ;;  %1003 = vset.pattern.permute.xlu2 %v1030_v4 }
   0x8   :  { %989 = vmatpush.msra.mxu2 %v40_v5  ;;  %75 = vperm.xlu2 %1003, %v53_v9  }
   0x9   :  { %138 = vmatpush.msra.mxu0 %v39_v6 }
   0xa   :  { %906 = vmatmul.msk.f32.vlgmr.msra.gmra.mxu0 %vm98_vm0, %v42_v7  ;;  %990 = vmatpush.msra.mxu2 %v39_v6 }
   0xb   :  { %18 = vsyncpa [#allocation6], 0  ;;  %v54_v11 = vld [vmem:[%s1326_s3 + $0x20] sm:$0xff]  ;;  %912 = vmatmul.msk.f32.vlgmr.msra.gmra.mxu2 %vm98_vm0, %v48_v8  ;;  %v52_v12 = vld [vmem:[%s1326_s3 + $0x10] sm:$0xff]  ;;  %v180_v34 = vlaneseq  ;;  %v1207_v45 = vstv %s1323_s0  ;;  %vm499_vm9 = vcmask 523264   ;;  %s897_s27 = sshll.u32 %s1333_s10, 4  ;;  %s898_s27 = int_to_ptr.hbm [resolvable:$true] %s897_s27 }
   0xc   :  { %v43_v13 = vld [vmem:[%s1325_s2 + $0x8] sm:$0xff]  ;;  %v49_v14 = vld [vmem:[%s1325_s2 + $0x38] sm:$0xff]  ;;  %v50_v16 = vld [vmem:[%s1326_s3] sm:$0xff] }
   0xd   :  { %90 = vperm.xlu0 %1001, %v56_v10   ;;  %v51_v15 = vld [vmem:[%s1326_s3 + $0x8] sm:$0xff]  ;;  %v458_v17 = vld [vmem:[%s1328_s5 + $0x38] sm:$0xff]  ;;  %v44_v18 = vld [vmem:[%s1325_s2 + $0x10] sm:$0xff]  ;;  %v1191_v35 = vshrl.u32 %v180_v34, 7  ;;  %v190_v37 = vand.u32 127, %v180_v34 }
   0xe   :  { %80 = vperm.xlu1 %1002, %v54_v11   ;;  %v457_v19 = vld [vmem:[%s1328_s5 + $0x30] sm:$0xff]  ;;  %v456_v20 = vld [vmem:[%s1328_s5 + $0x28] sm:$0xff]  ;;  %v455_v21 = vld [vmem:[%s1328_s5 + $0x20] sm:$0xff] }
   0xf   :  { %v45_v22 = vld [vmem:[%s1325_s2 + $0x18] sm:$0xff]  ;;  %v453_v24 = vld [vmem:[%s1328_s5 + $0x10] sm:$0xff]  ;;  %v452_v25 = vld [vmem:[%s1328_s5 + $0x8] sm:$0xff]  ;;  %v188_v36 = vadd.s32 56, %v1191_v35  ;;  %v1194_v38 = vshll.u32 %v190_v37, 10  ;;  %v187_v40 = vadd.s32 48, %v1191_v35 }
  0x10   :  { %70 = vperm.xlu2 %1003, %v52_v12   ;;  %v454_v23 = vld [vmem:[%s1328_s5 + $0x18] sm:$0xff]  ;;  %v46_v26 = vld [vmem:[%s1325_s2 + $0x20] sm:$0xff]  ;;  %v816_v29 = vld [vmem:[%s1330_s7 + $0x8] sm:$0xff]  ;;  %v186_v56 = vadd.s32 40, %v1191_v35  ;;  %v185_v60 = vadd.s32 32, %v1191_v35  ;;  %v184_v1 = vadd.s32 24, %v1191_v35 }
  0x11   :  { %v451_v27 = vld [vmem:[%s1328_s5] sm:$0xff]  ;;  %v47_v30 = vld [vmem:[%s1325_s2 + $0x28] sm:$0xff]  ;;  %v201_v39 = vshll.u32 %v188_v36, 2  ;;  %v200_v42 = vshll.u32 %v187_v40, 2  ;;  %v183_v7 = vadd.s32 16, %v1191_v35 }
  0x12   :  { %907 = vmatmul.msk.f32.gmra.mxu0 %vm98_vm0, %v43_v13  ;;  %v815_v28 = vld [vmem:[%s1330_s7] sm:$0xff]  ;;  %v861_v32 = vld [vmem:[%s1331_s8 + $0x8] sm:$0xff]  ;;  %v199_v59 = vshll.u32 %v186_v56, 2  ;;  %v198_v0 = vshll.u32 %v185_v60, 2  ;;  %v197_v6 = vshll.u32 %v184_v1, 2 }
  0x13   :  { %913 = vmatmul.msk.f32.gmra.mxu2 %vm98_vm0, %v49_v14  ;;  %v860_v31 = vld [vmem:[%s1331_s8] sm:$0xff]  ;;  %v1198_v41 = vadd.s32 %v201_v39, %v1194_v38  ;;  %v1202_v44 = vadd.s32 %v200_v42, %v1194_v38  ;;  %v196_v13 = vshll.u32 %v183_v7, 2  ;;  %v182_v14 = vadd.s32 8, %v1191_v35 }
  0x14   :  { %v881_v33 = vld [vmem:[#allocation4] sm:$0x1]  ;;  %v1215_v63 = vadd.s32 %v199_v59, %v1194_v38  ;;  %v1220_v5 = vadd.s32 %v198_v0, %v1194_v38  ;;  %v1226_v12 = vadd.s32 %v197_v6, %v1194_v38 }
  0x15   :  { %65 = vperm.xlu0 %1001, %v51_v15   ;;  %v217_v43 = vadd.s32 1, %v1198_v41  ;;  %v216_v47 = vadd.s32 1, %v1202_v44 }
  0x16   :  { %60 = vperm.xlu1 %1002, %v50_v16   ;;  %v215_v4 = vadd.s32 1, %v1215_v63  ;;  %v214_v11 = vadd.s32 1, %v1220_v5 }
  0x17   :  { %v226_v46 = vxor.u32 %v1207_v45, %v217_v43  ;;  %v225_v49 = vxor.u32 %v1207_v45, %v216_v47 }
  0x18   :  { %496 = vperm.xlu2 %1003, %v458_v17   ;;  %v224_v10 = vxor.u32 %v1207_v45, %v215_v4 }
  0x19   :  { %v234_v48 = vadd.s32 2654435769, %v226_v46  ;;  %v233_v51 = vadd.s32 2654435769, %v225_v49 }
  0x1a   :  { %908 = vmatmul.msk.f32.gmra.mxu0 %vm98_vm0, %v44_v18  ;;  %v232_v17 = vadd.s32 2654435769, %v224_v10  ;;  %v223_v18 = vxor.u32 %v1207_v45, %v214_v11 }
  0x1b   :  { %v242_v50 = vshll.u32 %v234_v48, 13  ;;  %v241_v53 = vshll.u32 %v233_v51, 13 }
  0x1d   :  { %491 = vperm.xlu0 %1001, %v457_v19   ;;  %v250_v52 = vxor.u32 %v242_v50, %v234_v48  ;;  %v249_v55 = vxor.u32 %v241_v53, %v233_v51  ;;  %v213_v19 = vadd.s32 1, %v1226_v12 }
  0x1e   :  { %486 = vperm.xlu1 %1002, %v456_v20   ;;  %v1232_v20 = vadd.s32 %v196_v13, %v1194_v38 }
  0x1f   :  { %v921_v54 = vshrl.u32 %v250_v52, 17  ;;  %v920_v58 = vshrl.u32 %v249_v55, 17 }
  0x20   :  { %481 = vperm.xlu2 %1003, %v455_v21   ;;  %v195_v21 = vshll.u32 %v182_v14, 2 }
  0x21   :  { %v274_v57 = vxor.u32 %v921_v54, %v250_v52  ;;  %v273_v62 = vxor.u32 %v920_v58, %v249_v55 }
  0x22   :  { %909 = vmatmul.msk.f32.gmra.mxu0 %vm98_vm0, %v45_v22 }
  0x23   :  { %v282_v61 = vshll.u32 %v274_v57, 5  ;;  %v281_v3 = vshll.u32 %v273_v62, 5 }
  0x25   :  { %476 = vperm.xlu0 %1001, %v454_v23   ;;  %v290_v2 = vxor.u32 %v282_v61, %v274_v57  ;;  %v289_v9 = vxor.u32 %v281_v3, %v273_v62 }
  0x26   :  { %471 = vperm.xlu1 %1002, %v453_v24   ;;  %v240_v24 = vshll.u32 %v232_v17, 13 }
  0x27   :  { %v298_v8 = vadd.s32 888888881, %v290_v2  ;;  %v297_v16 = vadd.s32 888888881, %v289_v9 }
  0x28   :  { %466 = vperm.xlu2 %1003, %v452_v25   ;;  %v231_v25 = vadd.s32 2654435769, %v223_v18 }
  0x29   :  { %v306_v15 = vshll.u32 %v298_v8, 13  ;;  %v305_v23 = vshll.u32 %v297_v16, 13 }
  0x2a   :  { %910 = vmatmul.msk.f32.gmra.mxu0 %vm98_vm0, %v46_v26  ;;  %v222_v26 = vxor.u32 %v1207_v45, %v213_v19 }
  0x2b   :  { %v314_v22 = vxor.u32 %v306_v15, %v298_v8 }
  0x2c   :  { %v230_v34 = vadd.s32 2654435769, %v222_v26 }
  0x2d   :  { %461 = vperm.xlu0 %1001, %v451_v27   ;;  %v212_v27 = vadd.s32 1, %v1232_v20 }
  0x2e   :  { %819 = vperm.xlu1 %1002, %v815_v28   ;;  %v1237_v28 = vadd.s32 %v195_v21, %v1194_v38  ;;  %v238_v47 = vshll.u32 %v230_v34, 13 }
  0x2f   :  { %v221_v36 = vxor.u32 %v1207_v45, %v212_v27 }
  0x30   :  { %824 = vperm.xlu2 %1003, %v816_v29   ;;  %v194_v29 = vshll.u32 %v1191_v35, 2  ;;  %v211_v37 = vadd.s32 1, %v1237_v28  ;;  %v246_v53 = vxor.u32 %v238_v47, %v230_v34 }
  0x31   :  { %v229_v48 = vadd.s32 2654435769, %v221_v36 }
  0x32   :  { %911 = vmatmul.msk.f32.gmra.mxu0 %vm98_vm0, %v47_v30  ;;  %v929_v30 = vshrl.u32 %v314_v22, 17  ;;  %v1243_v39 = vadd.s32 %v194_v29, %v1194_v38  ;;  %v220_v35 = vxor.u32 %v1207_v45, %v211_v37  ;;  %v917_v59 = vshrl.u32 %v246_v53, 17 }
  0x33   :  { %v237_v54 = vshll.u32 %v229_v48, 13 }
  0x34   :  { %v338_v40 = vxor.u32 %v929_v30, %v314_v22  ;;  %v210_v49 = vadd.s32 1, %v1243_v39  ;;  %v228_v55 = vadd.s32 2654435769, %v220_v35  ;;  %v270_v3 = vxor.u32 %v917_v59, %v246_v53 }
  0x35   :  { %864 = vperm.xlu0 %1001, %v860_v31   ;;  %v313_v31 = vxor.u32 %v305_v23, %v297_v16  ;;  %v245_v60 = vxor.u32 %v237_v54, %v229_v48 }
  0x36   :  { %869 = vperm.xlu1 %1002, %v861_v32   ;;  %v248_v32 = vxor.u32 %v240_v24, %v232_v17  ;;  %v219_v56 = vxor.u32 %v1207_v45, %v210_v49  ;;  %v346_v38 = vshll.u32 %v338_v40, 5  ;;  %v236_v61 = vshll.u32 %v228_v55, 13 }
  0x37   :  { %v928_v42 = vshrl.u32 %v313_v31, 17  ;;  %v916_v4 = vshrl.u32 %v245_v60, 17  ;;  %v278_v11 = vshll.u32 %v270_v3, 5 }
  0x38   :  { %884 = vperm.xlu2 %1003, %v881_v33   ;;  %v239_v33 = vshll.u32 %v231_v25, 13  ;;  %v919_v43 = vshrl.u32 %v248_v32, 17  ;;  %v227_v62 = vadd.s32 2654435769, %v219_v56  ;;  %v244_v6 = vxor.u32 %v236_v61, %v228_v55 }
  0x39   :  { %v337_v50 = vxor.u32 %v928_v42, %v313_v31  ;;  %v354_v8 = vxor.u32 %v346_v38, %v338_v40  ;;  %v269_v13 = vxor.u32 %v916_v4, %v245_v60  ;;  %v286_v17 = vxor.u32 %v278_v11, %v270_v3 }
  0x3a   :  { %v247_v46 = vxor.u32 %v239_v33, %v231_v25  ;;  %v272_v51 = vxor.u32 %v919_v43, %v248_v32  ;;  %v235_v7 = vshll.u32 %v227_v62, 13  ;;  %v915_v14 = vshrl.u32 %v244_v6, 17 }
  0x3b   :  { %v345_v0 = vshll.u32 %v337_v50, 5  ;;  %v277_v18 = vshll.u32 %v269_v13, 5  ;;  %v362_v22 = vadd.s32 3144134277, %v354_v8  ;;  %v294_v29 = vadd.s32 888888881, %v286_v17 }
  0x3c   :  { %v918_v52 = vshrl.u32 %v247_v46, 17  ;;  %v280_v57 = vshll.u32 %v272_v51, 5  ;;  %v243_v15 = vxor.u32 %v235_v7, %v227_v62  ;;  %v268_v19 = vxor.u32 %v915_v14, %v244_v6 }
  0x3d   :  { %v353_v16 = vxor.u32 %v345_v0, %v337_v50  ;;  %v285_v25 = vxor.u32 %v277_v18, %v269_v13  ;;  %v370_v36 = vshll.u32 %v362_v22, 13  ;;  %v302_v42 = vshll.u32 %v294_v29, 13 }
  0x3e   :  { %v271_v58 = vxor.u32 %v918_v52, %v247_v46  ;;  %v288_v1 = vxor.u32 %v280_v57, %v272_v51  ;;  %v914_v21 = vshrl.u32 %v243_v15, 17  ;;  %v276_v26 = vshll.u32 %v268_v19, 5 }
  0x3f   :  { %v361_v30 = vadd.s32 3144134277, %v353_v16  ;;  %v293_v34 = vadd.s32 888888881, %v285_v25  ;;  %v378_v51 = vxor.u32 %v370_v36, %v362_v22  ;;  %v310_v53 = vxor.u32 %v302_v42, %v294_v29 }
  0x40   :  { %v279_v2 = vshll.u32 %v271_v58, 5  ;;  %v296_v9 = vadd.s32 888888881, %v288_v1  ;;  %v267_v27 = vxor.u32 %v914_v21, %v243_v15  ;;  %v284_v31 = vxor.u32 %v276_v26, %v268_v19 }
  0x41   :  { %v369_v47 = vshll.u32 %v361_v30, 13  ;;  %v301_v49 = vshll.u32 %v293_v34, 13  ;;  %v925_v60 = vshrl.u32 %v310_v53, 17 }
  0x42   :  { %v287_v10 = vxor.u32 %v279_v2, %v271_v58  ;;  %v304_v24 = vshll.u32 %v296_v9, 13  ;;  %v275_v32 = vshll.u32 %v267_v27, 5  ;;  %v292_v43 = vadd.s32 888888881, %v284_v31 }
  0x43   :  { %v377_v55 = vxor.u32 %v369_v47, %v361_v30  ;;  %v309_v38 = vxor.u32 %v301_v49, %v293_v34  ;;  %v937_v58 = vshrl.u32 %v378_v51, 17 }
  0x44   :  { %v295_v23 = vadd.s32 888888881, %v287_v10  ;;  %v312_v37 = vxor.u32 %v304_v24, %v296_v9  ;;  %v283_v40 = vxor.u32 %v275_v32, %v267_v27  ;;  %v300_v54 = vshll.u32 %v292_v43, 13 }
  0x45   :  { %v936_v0 = vshrl.u32 %v377_v55, 17  ;;  %v924_v3 = vshrl.u32 %v309_v38, 17  ;;  %v402_v7 = vxor.u32 %v937_v58, %v378_v51  ;;  %v334_v10 = vxor.u32 %v925_v60, %v310_v53 }
  0x46   :  { %v303_v33 = vshll.u32 %v295_v23, 13  ;;  %v291_v50 = vadd.s32 888888881, %v283_v40  ;;  %v927_v52 = vshrl.u32 %v312_v37, 17  ;;  %v308_v61 = vxor.u32 %v300_v54, %v292_v43 }
  0x47   :  { %v401_v13 = vxor.u32 %v936_v0, %v377_v55  ;;  %v333_v15 = vxor.u32 %v924_v3, %v309_v38  ;;  %v410_v17 = vshll.u32 %v402_v7, 5  ;;  %v342_v21 = vshll.u32 %v334_v10, 5 }
  0x48   :  { %v311_v35 = vxor.u32 %v303_v33, %v295_v23  ;;  %v299_v57 = vshll.u32 %v291_v50, 13  ;;  %v336_v59 = vxor.u32 %v927_v52, %v312_v37  ;;  %v923_v11 = vshrl.u32 %v308_v61, 17 }
  0x49   :  { %v409_v24 = vshll.u32 %v401_v13, 5  ;;  %v341_v29 = vshll.u32 %v333_v15, 5  ;;  %v418_v31 = vxor.u32 %v410_v17, %v402_v7  ;;  %v350_v36 = vxor.u32 %v342_v21, %v334_v10 }
  0x4a   :  { %v926_v56 = vshrl.u32 %v311_v35, 17  ;;  %v307_v4 = vxor.u32 %v299_v57, %v291_v50  ;;  %v344_v8 = vshll.u32 %v336_v59, 5  ;;  %v332_v22 = vxor.u32 %v923_v11, %v308_v61 }
  0x4b   :  { %v417_v40 = vxor.u32 %v409_v24, %v401_v13  ;;  %v349_v47 = vxor.u32 %v341_v29, %v333_v15  ;;  %vm426_vm1 = vcmp.ge.s32.totalorder %v418_v31, 0 }
  0x4c   :  { %v335_v2 = vxor.u32 %v926_v56, %v311_v35  ;;  %v922_v16 = vshrl.u32 %v307_v4, 17  ;;  %v352_v18 = vxor.u32 %v344_v8, %v336_v59  ;;  %v340_v37 = vshll.u32 %v332_v22, 5 }
  0x4d   :  { %vm425_vm2 = vcmp.ge.s32.totalorder %v417_v40, 0  ;;  %v357_v56 = vadd.s32 3144134277, %v349_v47 }
  0x4e   :  { %v343_v14 = vshll.u32 %v335_v2, 5  ;;  %v331_v30 = vxor.u32 %v922_v16, %v307_v4  ;;  %v360_v32 = vadd.s32 3144134277, %v352_v18  ;;  %v348_v53 = vxor.u32 %v340_v37, %v332_v22 }
  0x4f   :  { %v365_v61 = vshll.u32 %v357_v56, 13 }
  0x50   :  { %v351_v27 = vxor.u32 %v343_v14, %v335_v2  ;;  %v339_v35 = vshll.u32 %v331_v30, 5  ;;  %v368_v49 = vshll.u32 %v360_v32, 13  ;;  %v356_v59 = vadd.s32 3144134277, %v348_v53 }
  0x52   :  { %v359_v43 = vadd.s32 3144134277, %v351_v27  ;;  %v347_v38 = vxor.u32 %v339_v35, %v331_v30  ;;  %v376_v57 = vxor.u32 %v368_v49, %v360_v32  ;;  %v364_v4 = vshll.u32 %v356_v59, 13 }
  0x54   :  { %v367_v55 = vshll.u32 %v359_v43, 13  ;;  %v935_v2 = vshrl.u32 %v376_v57, 17  ;;  %v372_v14 = vxor.u32 %v364_v4, %v356_v59 }
  0x56   :  { %v375_v60 = vxor.u32 %v367_v55, %v359_v43  ;;  %v400_v11 = vxor.u32 %v935_v2, %v376_v57  ;;  %v931_v22 = vshrl.u32 %v372_v14, 17 }
  0x58   :  { %v934_v8 = vshrl.u32 %v375_v60, 17 }
  0x5a   :  { %v399_v15 = vxor.u32 %v934_v8, %v375_v60  ;;  %v443_v8 = vld [vmem:[%s1327_s4] sm:$0xff] }
  0x5c   :  { %v407_v27 = vshll.u32 %v399_v15, 5 }
  0x5e   :  { %v415_v49 = vxor.u32 %v407_v27, %v399_v15  ;;  %v446_v15 = vld [vmem:[%s1327_s4 + $0x18] sm:$0xff] }
  0x60   :  { %vm423_vm4 = vcmp.ge.s32.totalorder %v415_v49, 0 }
  0x62   :  { %v76_v0 = vpop.permute.xlu2 %75 }
  0x6a   :  { %v71_v24 = vpop.permute.xlu2 %70 }
  0x77   :  { %v96_v46 = vpop.permute.xlu0 %95 }
  0x78   :  { %v86_v50 = vpop.permute.xlu1 %85 }
  0x7f   :  { %v91_v6 = vpop.permute.xlu0 %90 }
  0x87   :  { %v1248_v48 = vpop.f32.mrf.mxu0 }
  0x8e   :  { %v158_v62 = vpop.f32.mrf.mxu2 }
  0x8f   :  { %v1250_v1 = vpop.f32.mrf.mxu0  ;;  %v159_v9 = vadd.f32 %v158_v62, %v91_v6  ;;  %v355_v62 = vadd.s32 3144134277, %v347_v38  ;;  %v81_v6 = vpop.permute.xlu1 %80 }
  0x91   :  { %v170_v19 = vmul.f32 0.01, %v159_v9  ;;  %v363_v10 = vshll.u32 %v355_v62, 13 }
  0x93   :  { %v178_v33 = vmax.f32 %v159_v9, %v170_v19  ;;  %v373_v9 = vxor.u32 %v365_v61, %v357_v56  ;;  %v371_v17 = vxor.u32 %v363_v10, %v355_v62  ;;  %v408_v19 = vshll.u32 %v400_v11, 5  ;;  %v444_v10 = vld [vmem:[%s1327_s4 + $0x8] sm:$0xff] }
  0x95   :  { %v433_v51 = vmul.f32 2.0, %v178_v33  ;;  %v932_v16 = vshrl.u32 %v373_v9, 17  ;;  %v930_v30 = vshrl.u32 %v371_v17, 17  ;;  %v416_v37 = vxor.u32 %v408_v19, %v400_v11  ;;  %v449_v11 = vld [vmem:[%s1327_s4 + $0x30] sm:$0xff] }
  0x96   :  { %v161_v23 = vpop.f32.mrf.mxu2  ;;  %v587_v19 = vadd.s32 2, %v1202_v44 }
  0x97   :  { %v1252_v25 = vpop.f32.mrf.mxu0  ;;  %v162_v26 = vadd.f32 %v161_v23, %v96_v46  ;;  %v358_v46 = vadd.s32 3144134277, %v350_v36  ;;  %v397_v29 = vxor.u32 %v932_v16, %v373_v9  ;;  %v61_v36 = vpop.permute.xlu1 %60  ;;  %vm424_vm3 = vcmp.ge.s32.totalorder %v416_v37, 0  ;;  %v448_v9 = vld [vmem:[%s1327_s4 + $0x28] sm:$0xff]  ;;  %v447_v16 = vld [vmem:[%s1327_s4 + $0x20] sm:$0xff] }
  0x98   :  { %v147_v31 = vadd.f32 %v1252_v25, %v71_v24 }
  0x99   :  { %v171_v34 = vmul.f32 0.01, %v162_v26  ;;  %v366_v58 = vshll.u32 %v358_v46, 13 }
  0x9a   :  { %v166_v53 = vmul.f32 0.01, %v147_v31 }
  0x9b   :  { %v179_v42 = vmax.f32 %v162_v26, %v171_v34  ;;  %v374_v3 = vxor.u32 %v366_v58, %v358_v46  ;;  %v66_v34 = vpop.permute.xlu0 %65  ;;  %v141_v46 = vadd.f32 %v1248_v48, %v61_v36 }
  0x9c   :  { %v144_v43 = vadd.f32 %v1250_v1, %v66_v34  ;;  %v174_v60 = vmax.f32 %v147_v31, %v166_v53 }
  0x9d   :  { %v434_v52 = vmul.f32 2.0, %v179_v42  ;;  %v933_v13 = vshrl.u32 %v374_v3, 17  ;;  %v396_v42 = vxor.u32 %v931_v22, %v372_v14  ;;  %v164_v1 = vmul.f32 0.01, %v141_v46  ;;  %v450_v14 = vld [vmem:[%s1327_s4 + $0x38] sm:$0xff] }
  0x9e   :  { %v165_v56 = vmul.f32 0.01, %v144_v43  ;;  %v429_v4 = vmul.f32 2.0, %v174_v60  ;;  %v595_v22 = vxor.u32 %v587_v19, %v1207_v45 }
  0x9f   :  { %v149_v54 = vpop.f32.mrf.mxu0  ;;  %938 = vmatpush.msk.msra.mxu1 %vm426_vm1, %v434_v52  ;;  %991 = vmatpush.msk.msra.mxu3 %vm426_vm1, %v434_v52  ;;  %v398_v21 = vxor.u32 %v933_v13, %v374_v3  ;;  %v395_v52 = vxor.u32 %v930_v30, %v371_v17  ;;  %v172_v3 = vmax.f32 %v141_v46, %v164_v1  ;;  %v445_v13 = vld [vmem:[%s1327_s4 + $0x10] sm:$0xff]  ;;  %v588_v17 = vadd.s32 2, %v1198_v41 }
  0xa0   :  { %v150_v23 = vadd.f32 %v149_v54, %v76_v0  ;;  %v173_v48 = vmax.f32 %v144_v43, %v165_v56  ;;  %v585_v41 = vadd.s32 2, %v1220_v5 }
  0xa1   :  { %939 = vmatpush.msk.msra.mxu1 %vm425_vm2, %v433_v51  ;;  %992 = vmatpush.msk.msra.mxu3 %vm425_vm2, %v433_v51  ;;  %v406_v40 = vshll.u32 %v398_v21, 5  ;;  %v405_v51 = vshll.u32 %v397_v29, 5  ;;  %v403_v59 = vshll.u32 %v395_v52, 5 }
  0xa2   :  { %v167_v47 = vmul.f32 0.01, %v150_v23 }
  0xa3   :  { %v414_v25 = vxor.u32 %v406_v40, %v398_v21  ;;  %v413_v58 = vxor.u32 %v405_v51, %v397_v29  ;;  %v411_v2 = vxor.u32 %v403_v59, %v395_v52  ;;  %v593_v40 = vxor.u32 %v585_v41, %v1207_v45 }
  0xa4   :  { %v175_v38 = vmax.f32 %v150_v23, %v167_v47  ;;  %v586_v23 = vadd.s32 2, %v1215_v63  ;;  %v583_v51 = vadd.s32 2, %v1232_v20  ;;  %v581_v59 = vadd.s32 2, %v1243_v39 }
  0xa5   :  { %vm422_vm5 = vcmp.ge.s32.totalorder %v414_v25, 0  ;;  %vm421_vm6 = vcmp.ge.s32.totalorder %v413_v58, 0  ;;  %vm419_vm8 = vcmp.ge.s32.totalorder %v411_v2, 0  ;;  %v582_v25 = vadd.s32 2, %v1237_v28 }
  0xa6   :  { %v430_v0 = vmul.f32 2.0, %v175_v38  ;;  %v594_v27 = vxor.u32 %v586_v23, %v1207_v45 }
  0xa7   :  { %v152_v7 = vpop.f32.mrf.mxu0  ;;  %v590_v58 = vxor.u32 %v582_v25, %v1207_v45 }
  0xa8   :  { %v153_v18 = vadd.f32 %v152_v7, %v81_v6  ;;  %v428_v6 = vmul.f32 2.0, %v173_v48  ;;  %v427_v7 = vmul.f32 2.0, %v172_v3  ;;  %v602_v31 = vadd.s32 2654435769, %v594_v27 }
  0xa9   :  { %v598_v48 = vadd.s32 2654435769, %v590_v58 }
  0xaa   :  { %v168_v32 = vmul.f32 0.01, %v153_v18  ;;  %v610_v34 = vshll.u32 %v602_v31, 13 }
  0xac   :  { %v176_v54 = vmax.f32 %v153_v18, %v168_v32  ;;  %v596_v18 = vxor.u32 %v588_v17, %v1207_v45  ;;  %v618_v44 = vxor.u32 %v610_v34, %v602_v31 }
  0xae   :  { %v431_v61 = vmul.f32 2.0, %v176_v54  ;;  %v604_v21 = vadd.s32 2654435769, %v596_v18  ;;  %v959_v47 = vshrl.u32 %v618_v44, 17 }
  0xaf   :  { %v155_v26 = vpop.f32.mrf.mxu0 }
  0xb0   :  { %v156_v33 = vadd.f32 %v155_v26, %v86_v50  ;;  %v404_v50 = vshll.u32 %v396_v42, 5  ;;  %v612_v24 = vshll.u32 %v604_v21, 13  ;;  %v603_v26 = vadd.s32 2654435769, %v595_v22 }
  0xb1   :  { %v642_v53 = vxor.u32 %v959_v47, %v618_v44 }
  0xb2   :  { %v169_v35 = vmul.f32 0.01, %v156_v33  ;;  %v412_v62 = vxor.u32 %v404_v50, %v396_v42  ;;  %v620_v29 = vxor.u32 %v612_v24, %v604_v21  ;;  %v611_v30 = vshll.u32 %v603_v26, 13 }
  0xb3   :  { %v584_v42 = vadd.s32 2, %v1226_v12  ;;  %v650_v56 = vshll.u32 %v642_v53, 5 }
  0xb4   :  { %v177_v55 = vmax.f32 %v156_v33, %v169_v35  ;;  %vm420_vm7 = vcmp.ge.s32.totalorder %v412_v62, 0  ;;  %v961_v32 = vshrl.u32 %v620_v29, 17  ;;  %v619_v33 = vxor.u32 %v611_v30, %v603_v26 }
  0xb5   :  { %v601_v35 = vadd.s32 2654435769, %v593_v40  ;;  %v592_v49 = vxor.u32 %v584_v42, %v1207_v45  ;;  %v658_v20 = vxor.u32 %v650_v56, %v642_v53 }
  0xb6   :  { %v432_v57 = vmul.f32 2.0, %v177_v55  ;;  %v644_v36 = vxor.u32 %v961_v32, %v620_v29  ;;  %v960_v37 = vshrl.u32 %v619_v33, 17  ;;  %v591_v55 = vxor.u32 %v583_v51, %v1207_v45 }
  0xb7   :  { %v609_v54 = vshll.u32 %v601_v35, 13  ;;  %v600_v5 = vadd.s32 2654435769, %v592_v49 }
  0xb8   :  { %940 = vmatpush.msk.msra.mxu1 %vm424_vm3, %v432_v57  ;;  %993 = vmatpush.msk.msra.mxu3 %vm424_vm3, %v432_v57  ;;  %v652_v63 = vshll.u32 %v644_v36, 5  ;;  %v643_v43 = vxor.u32 %v960_v37, %v619_v33  ;;  %v599_v57 = vadd.s32 2654435769, %v591_v55 }
  0xb9   :  { %v617_v12 = vxor.u32 %v609_v54, %v601_v35  ;;  %v608_v38 = vshll.u32 %v600_v5, 13 }
  0xba   :  { %941 = vmatpush.msk.msra.mxu1 %vm423_vm4, %v431_v61  ;;  %994 = vmatpush.msk.msra.mxu3 %vm423_vm4, %v431_v61  ;;  %v660_v52 = vxor.u32 %v652_v63, %v644_v36  ;;  %v651_v46 = vshll.u32 %v643_v43, 5  ;;  %v607_v62 = vshll.u32 %v599_v57, 13 }
  0xbb   :  { %v958_v60 = vshrl.u32 %v617_v12, 17  ;;  %v616_v61 = vxor.u32 %v608_v38, %v600_v5 }
  0xbc   :  { %942 = vmatpush.msk.msra.mxu1 %vm422_vm5, %v430_v0  ;;  %995 = vmatpush.msk.msra.mxu3 %vm422_vm5, %v430_v0  ;;  %v659_v50 = vxor.u32 %v651_v46, %v643_v43  ;;  %v668_v1 = vadd.s32 888888881, %v660_v52  ;;  %v589_v0 = vxor.u32 %v581_v59, %v1207_v45 }
  0xbd   :  { %v641_v3 = vxor.u32 %v958_v60, %v617_v12  ;;  %v957_v28 = vshrl.u32 %v616_v61, 17 }
  0xbe   :  { %943 = vmatpush.msk.msra.mxu1 %vm421_vm6, %v429_v4  ;;  %996 = vmatpush.msk.msra.mxu3 %vm421_vm6, %v429_v4  ;;  %v667_v2 = vadd.s32 888888881, %v659_v50  ;;  %v615_v4 = vxor.u32 %v607_v62, %v599_v57 }
  0xc0   :  { %944 = vmatpush.msk.msra.mxu1 %vm420_vm7, %v428_v6  ;;  %997 = vmatpush.msk.msra.mxu3 %vm420_vm7, %v428_v6  ;;  %v606_v6 = vshll.u32 %v598_v48, 13 }
  0xc2   :  { %945 = vmatpush.msk.msra.mxu1 %vm419_vm8, %v427_v7  ;;  %998 = vmatpush.msk.msra.mxu3 %vm419_vm8, %v427_v7  ;;  %v597_v7 = vadd.s32 2654435769, %v589_v0  ;;  %v614_v39 = vxor.u32 %v606_v6, %v598_v48 }
  0xc3   :  { %946 = vmatmul.msk.f32.vlgmr.msra.gmra.mxu1 %vm499_vm9, %v443_v8  ;;  %951 = vmatmul.msk.f32.vlgmr.msra.gmra.mxu3 %vm499_vm9, %v448_v9  ;;  %v676_v8 = vshll.u32 %v668_v1, 13  ;;  %v666_v9 = vadd.s32 888888881, %v658_v20 }
  0xc4   :  { %v955_v19 = vshrl.u32 %v614_v39, 17 }
  0xc5   :  { %v684_v45 = vxor.u32 %v676_v8, %v668_v1  ;;  %v674_v22 = vshll.u32 %v666_v9, 13 }
  0xc6   :  { %v638_v26 = vxor.u32 %v955_v19, %v614_v39 }
  0xc7   :  { %v969_v34 = vshrl.u32 %v684_v45, 17  ;;  %v682_v41 = vxor.u32 %v674_v22, %v666_v9 }
  0xc8   :  { %v646_v32 = vshll.u32 %v638_v26, 5 }
  0xc9   :  { %v708_v47 = vxor.u32 %v969_v34, %v684_v45  ;;  %v967_v35 = vshrl.u32 %v682_v41, 17 }
  0xca   :  { %v654_v37 = vxor.u32 %v646_v32, %v638_v26 }
  0xcb   :  { %947 = vmatmul.msk.f32.gmra.mxu1 %vm499_vm9, %v444_v10  ;;  %952 = vmatmul.msk.f32.gmra.mxu3 %vm499_vm9, %v449_v11  ;;  %v649_v10 = vshll.u32 %v641_v3, 5  ;;  %v640_v11 = vxor.u32 %v957_v28, %v616_v61  ;;  %v716_v5 = vshll.u32 %v708_v47, 5  ;;  %v706_v55 = vxor.u32 %v967_v35, %v682_v41  ;;  %v492_v41 = vpop.permute.xlu0 %491 }
  0xcc   :  { %v662_v51 = vadd.s32 888888881, %v654_v37 }
  0xcd   :  { %v648_v17 = vshll.u32 %v640_v11, 5  ;;  %v724_v58 = vxor.u32 %v716_v5, %v708_v47  ;;  %v714_v59 = vshll.u32 %v706_v55, 5  ;;  %v487_v5 = vpop.permute.xlu1 %486 }
  0xce   :  { %v670_v50 = vshll.u32 %v662_v51, 13 }
  0xcf   :  { %v656_v23 = vxor.u32 %v648_v17, %v640_v11 }
  0xd0   :  { %v678_v20 = vxor.u32 %v670_v50, %v662_v51 }
  0xd1   :  { %v664_v36 = vadd.s32 888888881, %v656_v23 }
  0xd3   :  { %948 = vmatmul.msk.f32.gmra.mxu1 %vm499_vm9, %v445_v13  ;;  %953 = vmatmul.msk.f32.gmra.mxu3 %vm499_vm9, %v450_v14  ;;  %v956_v13 = vshrl.u32 %v615_v4, 17  ;;  %v605_v14 = vshll.u32 %v597_v7, 13  ;;  %v672_v49 = vshll.u32 %v664_v36, 13 }
  0xd5   :  { %v639_v18 = vxor.u32 %v956_v13, %v615_v4  ;;  %v613_v21 = vxor.u32 %v605_v14, %v597_v7  ;;  %v680_v25 = vxor.u32 %v672_v49, %v664_v36  ;;  %v963_v4 = vshrl.u32 %v678_v20, 17 }
  0xd7   :  { %v647_v24 = vshll.u32 %v639_v18, 5  ;;  %v954_v27 = vshrl.u32 %v613_v21, 17  ;;  %v965_v1 = vshrl.u32 %v680_v25, 17  ;;  %v702_v39 = vxor.u32 %v963_v4, %v678_v20 }
  0xd9   :  { %v655_v31 = vxor.u32 %v647_v24, %v639_v18  ;;  %v637_v33 = vxor.u32 %v954_v27, %v613_v21  ;;  %v704_v28 = vxor.u32 %v965_v1, %v680_v25  ;;  %v710_v23 = vshll.u32 %v702_v39, 5 }
  0xdb   :  { %949 = vmatmul.msk.f32.gmra.mxu1 %vm499_vm9, %v446_v15  ;;  %v675_v15 = vshll.u32 %v667_v2, 13  ;;  %v645_v44 = vshll.u32 %v637_v33, 5  ;;  %v663_v63 = vadd.s32 888888881, %v655_v31  ;;  %v712_v13 = vshll.u32 %v704_v28, 5 }
  0xdc   :  { %v718_v34 = vxor.u32 %v710_v23, %v702_v39 }
  0xdd   :  { %v683_v29 = vxor.u32 %v675_v15, %v667_v2  ;;  %v653_v43 = vxor.u32 %v645_v44, %v637_v33  ;;  %v671_v53 = vshll.u32 %v663_v63, 13  ;;  %v732_v2 = vadd.s32 3144134277, %v724_v58 }
  0xde   :  { %v720_v22 = vxor.u32 %v712_v13, %v704_v28  ;;  %v726_v49 = vadd.s32 3144134277, %v718_v34 }
  0xdf   :  { %v968_v40 = vshrl.u32 %v683_v29, 17  ;;  %v661_v54 = vadd.s32 888888881, %v653_v43  ;;  %v679_v38 = vxor.u32 %v671_v53, %v663_v63 }
  0xe0   :  { %v728_v33 = vadd.s32 3144134277, %v720_v22 }
  0xe1   :  { %v707_v52 = vxor.u32 %v968_v40, %v683_v29  ;;  %v669_v57 = vshll.u32 %v661_v54, 13  ;;  %v964_v62 = vshrl.u32 %v679_v38, 17 }
  0xe2   :  { %v736_v35 = vshll.u32 %v728_v33, 13 }
  0xe3   :  { %950 = vmatmul.msk.f32.gmra.mxu1 %vm499_vm9, %v447_v16  ;;  %v657_v16 = vxor.u32 %v649_v10, %v641_v3  ;;  %v715_v56 = vshll.u32 %v707_v52, 5  ;;  %v677_v48 = vxor.u32 %v669_v57, %v661_v54  ;;  %v722_v3 = vxor.u32 %v714_v59, %v706_v55 }
  0xe4   :  { %v703_v8 = vxor.u32 %v964_v62, %v679_v38  ;;  %v740_v10 = vshll.u32 %v732_v2, 13  ;;  %v744_v50 = vxor.u32 %v736_v35, %v728_v33  ;;  %v477_v62 = vpop.permute.xlu0 %476 }
  0xe5   :  { %v665_v30 = vadd.s32 888888881, %v657_v16  ;;  %v723_v60 = vxor.u32 %v715_v56, %v707_v52  ;;  %v962_v9 = vshrl.u32 %v677_v48, 17  ;;  %v730_v11 = vadd.s32 3144134277, %v722_v3 }
  0xe6   :  { %v711_v17 = vshll.u32 %v703_v8, 5  ;;  %v748_v21 = vxor.u32 %v740_v10, %v732_v2  ;;  %v734_v56 = vshll.u32 %v726_v49, 13  ;;  %v973_v28 = vshrl.u32 %v744_v50, 17 }
  0xe7   :  { %v673_v42 = vshll.u32 %v665_v30, 13  ;;  %v731_v6 = vadd.s32 3144134277, %v723_v60  ;;  %v701_v18 = vxor.u32 %v962_v9, %v677_v48  ;;  %v738_v45 = vshll.u32 %v730_v11, 13 }
  0xe8   :  { %v719_v27 = vxor.u32 %v711_v17, %v703_v8  ;;  %v977_v31 = vshrl.u32 %v748_v21, 17  ;;  %v742_v4 = vxor.u32 %v734_v56, %v726_v49 }
  0xe9   :  { %v681_v46 = vxor.u32 %v673_v42, %v665_v30  ;;  %v739_v15 = vshll.u32 %v731_v6, 13  ;;  %v709_v29 = vshll.u32 %v701_v18, 5  ;;  %v497_v30 = vpop.permute.xlu2 %496  ;;  %v746_v32 = vxor.u32 %v738_v45, %v730_v11  ;;  %v472_v45 = vpop.permute.xlu1 %471 }
  0xea   :  { %v727_v40 = vadd.s32 3144134277, %v719_v27  ;;  %v772_v43 = vxor.u32 %v977_v31, %v748_v21 }
  0xeb   :  { %v966_v12 = vshrl.u32 %v681_v46, 17  ;;  %v747_v24 = vxor.u32 %v739_v15, %v731_v6  ;;  %v717_v42 = vxor.u32 %v709_v29, %v701_v18  ;;  %v975_v47 = vshrl.u32 %v746_v32, 17 }
  0xec   :  { %v780_v55 = vshll.u32 %v772_v43, 5  ;;  %v768_v15 = vxor.u32 %v973_v28, %v744_v50 }
  0xed   :  { %v705_v61 = vxor.u32 %v966_v12, %v681_v46  ;;  %v976_v37 = vshrl.u32 %v747_v24, 17  ;;  %v735_v46 = vshll.u32 %v727_v40, 13  ;;  %v725_v53 = vadd.s32 3144134277, %v717_v42 }
  0xee   :  { %v770_v25 = vxor.u32 %v975_v47, %v746_v32  ;;  %v788_v2 = vxor.u32 %v780_v55, %v772_v43  ;;  %v776_v31 = vshll.u32 %v768_v15, 5 }
  0xef   :  { %v713_v7 = vshll.u32 %v705_v61, 5  ;;  %v771_v51 = vxor.u32 %v976_v37, %v747_v24  ;;  %v743_v1 = vxor.u32 %v735_v46, %v727_v40  ;;  %v733_v20 = vshll.u32 %v725_v53, 13  ;;  %v462_v37 = vpop.permute.xlu0 %461 }
  0xf0   :  { %v778_v3 = vshll.u32 %v770_v25, 5  ;;  %vm796_vm10 = vcmp.ge.s32.totalorder %v788_v2, 0  ;;  %v784_v35 = vxor.u32 %v776_v31, %v768_v15 }
  0xf1   :  { %v721_v16 = vxor.u32 %v713_v7, %v705_v61  ;;  %v482_v38 = vpop.permute.xlu2 %481  ;;  %v779_v58 = vshll.u32 %v771_v51, 5  ;;  %v972_v10 = vshrl.u32 %v743_v1, 17  ;;  %v741_v11 = vxor.u32 %v733_v20, %v725_v53 }
  0xf2   :  { %vm792_vm14 = vcmp.ge.s32.totalorder %v784_v35, 0 }
  0xf3   :  { %v729_v26 = vadd.s32 3144134277, %v721_v16  ;;  %v787_v8 = vxor.u32 %v779_v58, %v771_v51  ;;  %v971_v16 = vshrl.u32 %v742_v4, 17  ;;  %v767_v23 = vxor.u32 %v972_v10, %v743_v1  ;;  %v814_v1 = vld [vmem:[%s1329_s6 + $0x8] sm:$0xff] }
  0xf4   :  { %v970_v24 = vshrl.u32 %v741_v11, 17 }
  0xf5   :  { %v737_v44 = vshll.u32 %v729_v26, 13  ;;  %vm795_vm11 = vcmp.ge.s32.totalorder %v787_v8, 0  ;;  %v766_v32 = vxor.u32 %v971_v16, %v742_v4  ;;  %v775_v40 = vshll.u32 %v767_v23, 5 }
  0xf6   :  { %v765_v42 = vxor.u32 %v970_v24, %v741_v11 }
  0xf7   :  { %v745_v52 = vxor.u32 %v737_v44, %v729_v26  ;;  %v774_v49 = vshll.u32 %v766_v32, 5 }
  0xf8   :  { %v773_v53 = vshll.u32 %v765_v42, 5 }
  0xf9   :  { %v974_v59 = vshrl.u32 %v745_v52, 17  ;;  %v467_v29 = vpop.permute.xlu2 %466 }
  0xfb   :  { %v769_v9 = vxor.u32 %v974_v59, %v745_v52  ;;  %v813_v59 = vld [vmem:[%s1329_s6] sm:$0xff]  ;;  %s1031_s6 = smov [#allocation5]  }
  0xfc   :  { %s895_s24 = sshll.u32 %s1031_s6, 4  ;;  %s896_s24 = int_to_ptr.vmem [resolvable:$true] %s895_s24 }
  0xfd   :  { %v777_v22 = vshll.u32 %v769_v9, 5 }
  0xff   :  { %v785_v44 = vxor.u32 %v777_v22, %v769_v9 }
 0x101   :  { %vm793_vm13 = vcmp.ge.s32.totalorder %v785_v44, 0 }
 0x140   :  { %v1305_v0 = vpop.f32.mrf.mxu1 }
 0x141   :  { %v542_v43 = vadd.f32 %v1305_v0, %v462_v37  ;;  %v781_v0 = vxor.u32 %v773_v53, %v765_v42 }
 0x143   :  { %vm789_vm1 = vcmp.ge.s32.totalorder %v781_v0, 0 }
 0x146   :  { %v556_v14 = vpop.f32.mrf.mxu3 }
 0x147   :  { %v557_v12 = vadd.f32 %v556_v14, %v487_v5  ;;  %v786_v14 = vxor.u32 %v778_v3, %v770_v25  ;;  %v782_v25 = vxor.u32 %v774_v49, %v766_v32 }
 0x148   :  { %v1307_v19 = vpop.f32.mrf.mxu1 }
 0x149   :  { %v570_v6 = vmul.f32 0.01, %v557_v12  ;;  %vm794_vm12 = vcmp.ge.s32.totalorder %v786_v14, 0  ;;  %v545_v34 = vadd.f32 %v1307_v19, %v467_v29  ;;  %v783_v19 = vxor.u32 %v775_v40, %v767_v23 }
 0x14a   :  { %vm790_vm0 = vcmp.ge.s32.totalorder %v782_v25, 0 }
 0x14b   :  { %v578_v17 = vmax.f32 %v557_v12, %v570_v6  ;;  %v566_v51 = vmul.f32 0.01, %v545_v34  ;;  %vm791_vm15 = vcmp.ge.s32.totalorder %v783_v19, 0 }
 0x14d   :  { %v802_v33 = vmul.f32 2.0, %v578_v17  ;;  %v574_v50 = vmax.f32 %v545_v34, %v566_v51 }
 0x14e   :  { %v559_v36 = vpop.f32.mrf.mxu3 }
 0x14f   :  { %v560_v54 = vadd.f32 %v559_v36, %v492_v41 }
 0x150   :  { %v547_v63 = vpop.f32.mrf.mxu1 }
 0x151   :  { %v571_v60 = vmul.f32 0.01, %v560_v54  ;;  %v548_v27 = vadd.f32 %v547_v63, %v472_v45 }
 0x153   :  { %v579_v13 = vmax.f32 %v560_v54, %v571_v60  ;;  %v567_v63 = vmul.f32 0.01, %v548_v27  ;;  %v565_v54 = vmul.f32 0.01, %v542_v43  ;;  %v820_v60 = vpop.permute.xlu1 %819 }
 0x155   :  { %v803_v26 = vmul.f32 2.0, %v579_v13  ;;  %v575_v5 = vmax.f32 %v548_v27, %v567_v63  ;;  %v573_v12 = vmax.f32 %v542_v43, %v565_v54 }
 0x156   :  { %v562_v57 = vpop.f32.mrf.mxu3 }
 0x157   :  { %v563_v61 = vadd.f32 %v562_v57, %v497_v30  ;;  %v798_v57 = vmul.f32 2.0, %v574_v50  ;;  %v797_v58 = vmul.f32 2.0, %v573_v12 }
 0x158   :  { %v550_v48 = vpop.f32.mrf.mxu1 }
 0x159   :  { %v572_v7 = vmul.f32 0.01, %v563_v61  ;;  %v551_v21 = vadd.f32 %v550_v48, %v477_v62  ;;  %v825_v48 = vpop.permute.xlu2 %824 }
 0x15b   :  { %v580_v39 = vmax.f32 %v563_v61, %v572_v7  ;;  %v568_v41 = vmul.f32 0.01, %v551_v21  ;;  %v865_v7 = vpop.permute.xlu0 %864  ;;  %v870_v8 = vpop.permute.xlu1 %869 }
 0x15d   :  { %v804_v18 = vmul.f32 2.0, %v580_v39  ;;  %v576_v52 = vmax.f32 %v551_v21, %v568_v41 }
 0x15f   :  { %978 = vmatpush.msk.msrb.mxu2 %vm796_vm10, %v804_v18  ;;  %v800_v56 = vmul.f32 2.0, %v576_v52 }
 0x160   :  { %v553_v30 = vpop.f32.mrf.mxu1 }
 0x161   :  { %v554_v36 = vadd.f32 %v553_v30, %v482_v38  ;;  %979 = vmatpush.msk.msrb.mxu2 %vm795_vm11, %v803_v26  ;;  %v799_v38 = vmul.f32 2.0, %v575_v5  ;;  %v885_v16 = vpop.permute.xlu2 %884 }
 0x162   :  { %v887_v18 = vperm.slane %v885_v16, 0 }
 0x163   :  { %v569_v47 = vmul.f32 0.01, %v554_v36  ;;  %980 = vmatpush.msk.msrb.mxu2 %vm794_vm12, %v802_v33 }
 0x165   :  { %v577_v46 = vmax.f32 %v554_v36, %v569_v47 }
 0x167   :  { %v801_v55 = vmul.f32 2.0, %v577_v46 }
 0x169   :  { %981 = vmatpush.msk.msrb.mxu2 %vm793_vm13, %v801_v55 }
 0x16b   :  { %982 = vmatpush.msk.msrb.mxu2 %vm792_vm14, %v800_v56 }
 0x16d   :  { %983 = vmatpush.msk.msrb.mxu2 %vm791_vm15, %v799_v38 }
 0x16f   :  { %984 = vmatpush.msk.msrb.mxu2 %vm790_vm0, %v798_v57 }
 0x171   :  { %985 = vmatpush.msk.msrb.mxu2 %vm789_vm1, %v797_v58 }
 0x172   :  { %986 = vmatmul.msk.f32.vlgmr.msrb.gmra.mxu2 %vm499_vm9, %v813_v59 }
 0x17a   :  { %987 = vmatmul.msk.f32.gmra.mxu2 %vm499_vm9, %v814_v1 }
 0x1f5   :  { %v850_v20 = vpop.f32.mrf.mxu2 }
 0x1f6   :  { %v851_v61 = vadd.f32 %v850_v20, %v820_v60 }
 0x1f8   :  { %v856_v62 = vmul.f32 0.01, %v851_v61 }
 0x1fa   :  { %v858_v28 = vmax.f32 %v851_v61, %v856_v62 }
 0x1fc   :  { %v872_v9 = vmul.f32 %v865_v7, %v858_v28 }
 0x1fd   :  { %v853_v2 = vpop.f32.mrf.mxu2 }
 0x1fe   :  { %v854_v3 = vadd.f32 %v853_v2, %v825_v48 }
 0x200   :  { %v857_v4 = vmul.f32 0.01, %v854_v3 }
 0x202   :  { %v859_v6 = vmax.f32 %v854_v3, %v857_v4 }
 0x204   :  { %v873_v10 = vmul.f32 %v870_v8, %v859_v6 }
 0x206   :  { %v874_v11 = vadd.f32 %v873_v10, %v872_v9 }
 0x208   :  { %v875_v13 = vrot.slane %v874_v11, 4 }
 0x20a   :  { %v876_v39 = vadd.f32 %v875_v13, %v874_v11 }
 0x20c   :  { %v877_v14 = vrot.slane %v876_v39, 2 }
 0x20e   :  { %v878_v15 = vadd.f32 %v877_v14, %v876_v39 }
 0x210   :  { %v879_v17 = vrot.slane %v878_v15, 1 }
 0x212   :  { %v880_v21 = vadd.f32 %v879_v17, %v878_v15 }
 0x214   :  { %v888_v45 = vadd.f32 %v887_v18, %v880_v21 }
 0x216   :  { %889 = vst [vmem:[#allocation5] sm:$0x1] %v888_v45 }
 0x217   :  { %900 = dma.vmem_to_hbm [thread:$0]  %s896_s24, 16, %s898_s27, [#allocation6]  }
 0x218   :  { %1028 = dma.done.wait [#allocation6], 16  }
 0x219   :  { %1029 = vsyncadd [#allocation6], 4294967280 }
 0x21a   :  { %905 = vsyncpa [#allocation6], 1 }

</bundles_post_ra>
